<compile_context>
chip_gen: v7x
topology: tpu7x:2x2x1
jax: 0.10.0
libtpu: 0.0.40
codegen_flags: <defaults>
</compile_context>

<pallas_src>
import functools

import jax
import jax.numpy as jnp
from jax.experimental import pallas as pl
from jax.experimental.pallas import tpu as pltpu


def _round_up(x, m):
    return (x + m - 1) // m * m


def _policy_kernel(x_ref, w1_ref, b1_ref, w2_ref, b2_ref, w3_ref, b3_ref,
                   o_ref, *, max_action):
    """Fused 3-layer MLP: relu(x@W1+b1) -> relu(@W2+b2) -> tanh(@W3+b3)*max_a."""
    x = x_ref[...].astype(jnp.bfloat16)   # in-kernel bf16 cast (free VPU filler)

    h1 = jnp.dot(x, w1_ref[...], preferred_element_type=jnp.float32) + b1_ref[...]
    h1 = jnp.maximum(h1, 0.0)

    h2 = jnp.dot(h1.astype(jnp.bfloat16), w2_ref[...],
                 preferred_element_type=jnp.float32) + b2_ref[...]
    h2 = jnp.maximum(h2, 0.0)

    h3 = jnp.dot(h2.astype(jnp.bfloat16), w3_ref[...],
                 preferred_element_type=jnp.float32) + b3_ref[...]

    o_ref[...] = (jnp.tanh(h3) * max_action).astype(o_ref.dtype)


def prepare_params(params):
    """One-time weight prep, hoisted out of the per-call forward path.

    Pads weight *output* dims (and w2/w3 input dims, which must match the
    padded hidden activations) to multiples of 128 and casts weights to bf16.
    Biases stay f32.  Call once at init / after each optimizer step.
    """
    obs, hid = params["w1"].shape
    act = params["w3"].shape[1]
    hid_p = _round_up(hid, 128)
    act_p = _round_up(act, 128)

    def pad2(a, rows, cols):
        return jnp.pad(a, ((0, rows - a.shape[0]), (0, cols - a.shape[1])))

    return dict(
        w1=pad2(params["w1"], obs, hid_p).astype(jnp.bfloat16),   # K left at obs
        w2=pad2(params["w2"], hid_p, hid_p).astype(jnp.bfloat16),
        w3=pad2(params["w3"], hid_p, act_p).astype(jnp.bfloat16),
        b1=pad2(params["b1"], 1, hid_p),
        b2=pad2(params["b2"], 1, hid_p),
        b3=pad2(params["b3"], 1, act_p),
    )


def _choose_tile_b(batch, tile_b):
    """Pick the batch tile: big (amortize step overhead), multiple of 16
    (bf16 sublane packing), and >= 2 grid steps when the batch allows
    (megacore sharding on v7x)."""
    tile_b = min(tile_b, _round_up(max(pl.cdiv(batch, 2), 1), 16))
    tile_b = min(tile_b, _round_up(batch, 16))
    return max(tile_b, 16)


def policy_forward(state, prepared, max_action, *, action_dim,
                   tile_b=2048, out_dtype=jnp.float32):
    """Runs the fused policy MLP Pallas kernel.

    state:    (B, observation_dim) float32 (unpadded, streamed directly)
    prepared: output of prepare_params(params)
    Returns (B, action_dim) in out_dtype.
    """
    B, obs = state.shape
    assert prepared["w1"].shape[0] == obs
    hid_p = prepared["w2"].shape[0]
    act_p = prepared["w3"].shape[1]

    tile_b = _choose_tile_b(B, tile_b)
    grid = (pl.cdiv(B, tile_b),)

    # Weights/biases: constant index_map -> fetched once, VMEM-resident.
    resident = lambda a: pl.BlockSpec(a.shape, lambda i: (0, 0))

    out_itemsize = jnp.dtype(out_dtype).itemsize
    cost = pl.CostEstimate(
        flops=2 * B * (obs * hid_p + hid_p * hid_p + hid_p * act_p),
        transcendentals=B * act_p,
        bytes_accessed=(state.size * state.dtype.itemsize
                        + sum(prepared[k].size * prepared[k].dtype.itemsize
                              for k in ("w1", "w2", "w3", "b1", "b2", "b3"))
                        + B * act_p * out_itemsize),
    )

    kernel = functools.partial(_policy_kernel, max_action=float(max_action))

    out_p = pl.pallas_call(
        kernel,
        out_shape=jax.ShapeDtypeStruct((B, act_p), out_dtype),
        grid=grid,
        in_specs=[
            # Streams over the batch; last dim == full array dim (legal even
            # when obs is not a multiple of 128); ragged last block handled
            # by Pallas (OOB rows are garbage-in, write-masked-out).
            pl.BlockSpec((tile_b, obs), lambda i: (i, 0)),
            resident(prepared["w1"]), resident(prepared["b1"]),
            resident(prepared["w2"]), resident(prepared["b2"]),
            resident(prepared["w3"]), resident(prepared["b3"]),
        ],
        out_specs=pl.BlockSpec((tile_b, act_p), lambda i: (i, 0)),
        compiler_params=pltpu.CompilerParams(
            dimension_semantics=("parallel",)),   # megacore sharding on v7x
        cost_estimate=cost,
    )(state, prepared["w1"], prepared["b1"], prepared["w2"], prepared["b2"],
      prepared["w3"], prepared["b3"])

    return out_p[:, :action_dim]


def init_params(key, observation_dim, hidden_size, action_dim):
    """Deterministic init mimicking torch.nn.Linear default U[-1/sqrt(fan_in), +)."""
    ks = jax.random.split(key, 6)

    def lin(kw, kb, fan_in, fan_out):
        bound = 1.0 / jnp.sqrt(fan_in)
        w = jax.random.uniform(kw, (fan_in, fan_out), jnp.float32, -bound, bound)
        b = jax.random.uniform(kb, (1, fan_out), jnp.float32, -bound, bound)
        return w, b

    w1, b1 = lin(ks[0], ks[1], observation_dim, hidden_size)
    w2, b2 = lin(ks[2], ks[3], hidden_size, hidden_size)
    w3, b3 = lin(ks[4], ks[5], hidden_size, action_dim)
    return dict(w1=w1, b1=b1, w2=w2, b2=b2, w3=w3, b3=b3)


def policy_forward_ref(state, params, max_action, *, bf16=False):
    """Pure-JAX reference.  bf16=True mirrors the kernel's MXU input dtype."""
    cast = (lambda a: a.astype(jnp.bfloat16)) if bf16 else (lambda a: a)
    dot = lambda a, b: jnp.dot(cast(a), cast(b), preferred_element_type=jnp.float32)
    h1 = jnp.maximum(dot(state, params["w1"]) + params["b1"], 0.0)
    h2 = jnp.maximum(dot(h1, params["w2"]) + params["b2"], 0.0)
    return jnp.tanh(dot(h2, params["w3"]) + params["b3"]) * max_action


if __name__ == "__main__":
    # Small shapes consistent with the module's forward.  At this size the
    # kernel is launch/DMA-overhead bound; the design pays off when many
    # policy evaluations are batched into one call (large B).
    batch = 2
    observation_dim = 16
    hidden_size = 32
    action_dim = 8
    max_action = 2.0

    key = jax.random.PRNGKey(0)
    k_state, k_params, k_state2 = jax.random.split(key, 3)

    state = jax.random.normal(k_state, (batch, observation_dim), jnp.float32)
    params = init_params(k_params, observation_dim, hidden_size, action_dim)

    # Hoisted weight prep: done once, reused for every forward call.
    prepared = prepare_params(params)

    out = policy_forward(state, prepared, max_action, action_dim=action_dim)
    out = jax.block_until_ready(out)
    assert out.shape == (batch, action_dim)

    # Tight check vs a reference that uses the same bf16 MXU inputs.
    ref_bf16 = policy_forward_ref(state, params, max_action, bf16=True)
    assert jnp.allclose(out, ref_bf16, atol=1e-4, rtol=1e-4)

    # Loose sanity check vs the full-f32 PyTorch-equivalent math.
    ref_f32 = policy_forward_ref(state, params, max_action, bf16=False)
    assert jnp.allclose(out, ref_f32, atol=5e-2, rtol=5e-2)

    # Exercise the multi-step grid + ragged last batch block path.
    batch2 = 48   # tile_b resolves to 32 -> grid=(2,), last block ragged (16 rows)
    state2 = jax.random.normal(k_state2, (batch2, observation_dim), jnp.float32)
    out2 = jax.block_until_ready(
        policy_forward(state2, prepared, max_action, action_dim=action_dim))
    assert out2.shape == (batch2, action_dim)
    ref2 = policy_forward_ref(state2, params, max_action, bf16=True)
    assert jnp.allclose(out2, ref2, atol=1e-4, rtol=1e-4)

    # TODO(synk): .fit() / Adam optimizer step is training-side and has no
    # forward-pass Pallas equivalent; only forward() is implemented.
    print("KERNEL_OK")
</pallas_src>

<mosaic_0001>
module attributes {stable_mosaic.version = 11 : i64} {
  func.func @_policy_kernel(%arg0: i32, %arg1: memref<16x16xf32, #tpu.memory_space<vmem>>, %arg2: memref<16x128xbf16, #tpu.memory_space<vmem>>, %arg3: memref<1x128xf32, #tpu.memory_space<vmem>>, %arg4: memref<128x128xbf16, #tpu.memory_space<vmem>>, %arg5: memref<1x128xf32, #tpu.memory_space<vmem>>, %arg6: memref<128x128xbf16, #tpu.memory_space<vmem>>, %arg7: memref<1x128xf32, #tpu.memory_space<vmem>>, %arg8: memref<16x128xf32, #tpu.memory_space<vmem>>) attributes {dimension_semantics = [#tpu.dimension_semantics<parallel>], iteration_bounds = array<i64: 1>, scalar_prefetch = 0 : i64, scratch_operands = 0 : i64, tpu.core_type = #tpu.core_type<tc>, window_params = [{transform_indices = @transform_0, window_bounds = array<i64: 16, 16>}, {pipeline_mode = #tpu.pipeline_mode<synchronous>, transform_indices = @transform_1, window_bounds = array<i64: 16, 128>}, {pipeline_mode = #tpu.pipeline_mode<synchronous>, transform_indices = @transform_2, window_bounds = array<i64: 1, 128>}, {pipeline_mode = #tpu.pipeline_mode<synchronous>, transform_indices = @transform_3, window_bounds = array<i64: 128, 128>}, {pipeline_mode = #tpu.pipeline_mode<synchronous>, transform_indices = @transform_4, window_bounds = array<i64: 1, 128>}, {pipeline_mode = #tpu.pipeline_mode<synchronous>, transform_indices = @transform_5, window_bounds = array<i64: 128, 128>}, {pipeline_mode = #tpu.pipeline_mode<synchronous>, transform_indices = @transform_6, window_bounds = array<i64: 1, 128>}, {transform_indices = @transform_7, window_bounds = array<i64: 16, 128>}]} {
    %c0 = arith.constant 0 : index
    %c0_0 = arith.constant 0 : index
    %0 = vector.load %arg1[%c0, %c0_0] : memref<16x16xf32, #tpu.memory_space<vmem>>, vector<16x16xf32>
    %1 = arith.truncf %0 : vector<16x16xf32> to vector<16x16xbf16>
    %c0_1 = arith.constant 0 : index
    %c0_2 = arith.constant 0 : index
    %2 = vector.load %arg2[%c0_1, %c0_2] : memref<16x128xbf16, #tpu.memory_space<vmem>>, vector<16x128xbf16>
    %cst = arith.constant dense<0.000000e+00> : vector<16x128xf32>
    %3 = tpu.matmul %1, %2, %cst {dimension_numbers = #tpu.dot_dimension_numbers<[1], [0], [0], [1], [0, 0, 1, 1], [], []>} : vector<16x16xbf16>, vector<16x128xbf16>, vector<16x128xf32> -> vector<16x128xf32>
    %c0_3 = arith.constant 0 : index
    %c0_4 = arith.constant 0 : index
    %4 = vector.load %arg3[%c0_3, %c0_4] : memref<1x128xf32, #tpu.memory_space<vmem>>, vector<1x128xf32>
    %5 = vector.broadcast %4 : vector<1x128xf32> to vector<16x128xf32>
    %6 = arith.addf %3, %5 : vector<16x128xf32>
    %cst_5 = arith.constant 0.000000e+00 : f32
    %7 = vector.broadcast %cst_5 : f32 to vector<16x128xf32>
    %8 = arith.maximumf %6, %7 : vector<16x128xf32>
    %9 = arith.truncf %8 : vector<16x128xf32> to vector<16x128xbf16>
    %c0_6 = arith.constant 0 : index
    %c0_7 = arith.constant 0 : index
    %10 = vector.load %arg4[%c0_6, %c0_7] : memref<128x128xbf16, #tpu.memory_space<vmem>>, vector<128x128xbf16>
    %cst_8 = arith.constant dense<0.000000e+00> : vector<16x128xf32>
    %11 = tpu.matmul %9, %10, %cst_8 {dimension_numbers = #tpu.dot_dimension_numbers<[1], [0], [0], [1], [0, 0, 1, 1], [], []>} : vector<16x128xbf16>, vector<128x128xbf16>, vector<16x128xf32> -> vector<16x128xf32>
    %c0_9 = arith.constant 0 : index
    %c0_10 = arith.constant 0 : index
    %12 = vector.load %arg5[%c0_9, %c0_10] : memref<1x128xf32, #tpu.memory_space<vmem>>, vector<1x128xf32>
    %13 = vector.broadcast %12 : vector<1x128xf32> to vector<16x128xf32>
    %14 = arith.addf %11, %13 : vector<16x128xf32>
    %cst_11 = arith.constant 0.000000e+00 : f32
    %15 = vector.broadcast %cst_11 : f32 to vector<16x128xf32>
    %16 = arith.maximumf %14, %15 : vector<16x128xf32>
    %17 = arith.truncf %16 : vector<16x128xf32> to vector<16x128xbf16>
    %c0_12 = arith.constant 0 : index
    %c0_13 = arith.constant 0 : index
    %18 = vector.load %arg6[%c0_12, %c0_13] : memref<128x128xbf16, #tpu.memory_space<vmem>>, vector<128x128xbf16>
    %cst_14 = arith.constant dense<0.000000e+00> : vector<16x128xf32>
    %19 = tpu.matmul %17, %18, %cst_14 {dimension_numbers = #tpu.dot_dimension_numbers<[1], [0], [0], [1], [0, 0, 1, 1], [], []>} : vector<16x128xbf16>, vector<128x128xbf16>, vector<16x128xf32> -> vector<16x128xf32>
    %c0_15 = arith.constant 0 : index
    %c0_16 = arith.constant 0 : index
    %20 = vector.load %arg7[%c0_15, %c0_16] : memref<1x128xf32, #tpu.memory_space<vmem>>, vector<1x128xf32>
    %21 = vector.broadcast %20 : vector<1x128xf32> to vector<16x128xf32>
    %22 = arith.addf %19, %21 : vector<16x128xf32>
    %23 = math.tanh %22 : vector<16x128xf32>
    %cst_17 = arith.constant 2.000000e+00 : f32
    %24 = vector.broadcast %cst_17 : f32 to vector<16x128xf32>
    %25 = arith.mulf %23, %24 : vector<16x128xf32>
    %c0_18 = arith.constant 0 : index
    %c0_19 = arith.constant 0 : index
    %26 = vector.load %arg8[%c0_18, %c0_19] : memref<16x128xf32, #tpu.memory_space<vmem>>, vector<16x128xf32>
    tpu.vector_store %arg8[%c0_18, %c0_19], %25 {strides = array<i32>} : memref<16x128xf32, #tpu.memory_space<vmem>>, vector<16x128xf32>,
    return
  }
  func.func @transform_0(%arg0: i32) -> (i32, i32) {
    %c0_i32 = arith.constant 0 : i32
    %c0_i32_0 = arith.constant 0 : i32
    return %arg0, %c0_i32 : i32, i32
  }
  func.func @transform_1(%arg0: i32) -> (i32, i32) {
    %c0_i32 = arith.constant 0 : i32
    %c0_i32_0 = arith.constant 0 : i32
    %c0_i32_1 = arith.constant 0 : i32
    return %c0_i32, %c0_i32_0 : i32, i32
  }
  func.func @transform_2(%arg0: i32) -> (i32, i32) {
    %c0_i32 = arith.constant 0 : i32
    %c0_i32_0 = arith.constant 0 : i32
    %c0_i32_1 = arith.constant 0 : i32
    return %c0_i32, %c0_i32_0 : i32, i32
  }
  func.func @transform_3(%arg0: i32) -> (i32, i32) {
    %c0_i32 = arith.constant 0 : i32
    %c0_i32_0 = arith.constant 0 : i32
    %c0_i32_1 = arith.constant 0 : i32
    return %c0_i32, %c0_i32_0 : i32, i32
  }
  func.func @transform_4(%arg0: i32) -> (i32, i32) {
    %c0_i32 = arith.constant 0 : i32
    %c0_i32_0 = arith.constant 0 : i32
    %c0_i32_1 = arith.constant 0 : i32
    return %c0_i32, %c0_i32_0 : i32, i32
  }
  func.func @transform_5(%arg0: i32) -> (i32, i32) {
    %c0_i32 = arith.constant 0 : i32
    %c0_i32_0 = arith.constant 0 : i32
    %c0_i32_1 = arith.constant 0 : i32
    return %c0_i32, %c0_i32_0 : i32, i32
  }
  func.func @transform_6(%arg0: i32) -> (i32, i32) {
    %c0_i32 = arith.constant 0 : i32
    %c0_i32_0 = arith.constant 0 : i32
    %c0_i32_1 = arith.constant 0 : i32
    return %c0_i32, %c0_i32_0 : i32, i32
  }
  func.func @transform_7(%arg0: i32) -> (i32, i32) {
    %c0_i32 = arith.constant 0 : i32
    %c0_i32_0 = arith.constant 0 : i32
    return %arg0, %c0_i32 : i32, i32
  }
}

</mosaic_0001>

<bundles_post_ra>
// kernel: tpu_custom_call.1
= control target key start
LH: loop header
LB: loop body
LE: loop exit
PB: predicated region body
PF: predicated region fallthrough
CT: control target
= control target key end

     0   :  { %12 = vsyncpa [#allocation3], 0  ;;  %s803_s0 = inlined_call_operand.hbm [shape: f32[2,16], index: 0, kind: input, shape index: {}]   ;;  %s804_s1 = inlined_call_operand.hbm [shape: bf16[16,128], index: 1, kind: input, shape index: {}]   ;;  %s805_s2 = inlined_call_operand.vmem [shape: f32[1,128], index: 2, kind: input, shape index: {}]   ;;  %s806_s3 = inlined_call_operand.hbm [shape: bf16[128,128], index: 3, kind: input, shape index: {}]   ;;  %s807_s4 = inlined_call_operand.vmem [shape: f32[1,128], index: 4, kind: input, shape index: {}]   ;;  %s808_s5 = inlined_call_operand.hbm [shape: bf16[128,128], index: 5, kind: input, shape index: {}]   ;;  %s809_s6 = inlined_call_operand.vmem [shape: f32[1,128], index: 6, kind: input, shape index: {}]   ;;  %s810_s7 = inlined_call_operand.hbm [shape: f32[2,128], index: 7, kind: output, shape index: {}]  }
   0x1   :  { %13 = vsyncpa [#allocation6], 0 }
   0x2   :  { %14 = vsyncpa [#allocation9], 0 }
   0x3   :  { %15 = vsyncpa [#allocation4], 0 }
   0x4   :  { %20 = vsyncadd [#allocation3], 224  ;;  %s638_s24 = smov [#allocation5]   ;;  %s520_s28 = scalar_lea.hbm %s804_s1, 128 }
   0x5   :  { %s33_s25 = sshll.u32 %s638_s24, 4  ;;  %p521_p0 = scmp.ne.s32.totalorder %s804_s1, %s520_s28  ;;  %s34_s25 = int_to_ptr.vmem [resolvable:$true] %s33_s25 }
   0x6   :  { %p524_p1 = scmp.lt.u32.totalorder %s520_s28, %s804_s1 }
   0x8   :  { %p526_p2 = pnand %p524_p1, %p521_p0 }
   0xa   :  { %529 = shalt.err (!%p526_p2)
}
   0xb   :  { %s530_s10 = scalar_lea.vmem %s34_s25, 128  ;;  %p535_p4 = scmp.lt.s32.totalorder %s34_s25, %s34_s25 }
   0xc   :  { %p531_p3 = scmp.ne.s32.totalorder %s34_s25, %s530_s10  ;;  %p536_p5 = scmp.lt.s32.totalorder %s530_s10, %s530_s10 }
   0xe   :  { %p537_p6 = por %p536_p5, %p535_p4 }
  0x10   :  { %p538_p7 = pnand %p537_p6, %p531_p3 }
  0x12   :  { %541 = shalt.err (!%p538_p7)
}
  0x13   :  { %s639_s11 = smov 64   ;;  %s640_s12 = smov 4  }
  0x14   :  { %39 = dma.hbm_to_vmem [thread:$0]  %s804_s1, 128, %s34_s25, [#allocation6], %s639_s11, %s639_s11, %s640_s12  }
  0x15   :  { %s641_s15 = smov [#allocation2]   ;;  %s542_s19 = scalar_lea.hbm %s803_s0, 32 }
  0x16   :  { %s21_s16 = sshll.u32 %s641_s15, 4  ;;  %p543_p8 = scmp.ne.s32.totalorder %s803_s0, %s542_s19  ;;  %s22_s16 = int_to_ptr.vmem [resolvable:$true] %s21_s16 }
  0x17   :  { %p546_p9 = scmp.lt.u32.totalorder %s542_s19, %s803_s0 }
  0x19   :  { %p548_p10 = pnand %p546_p9, %p543_p8 }
  0x1b   :  { %551 = shalt.err (!%p548_p10)
}
  0x1c   :  { %s552_s24 = scalar_lea.vmem %s22_s16, 32  ;;  %s556_s1 = scalar_lea.vmem %s22_s16, 256 }
  0x1d   :  { %p553_p11 = scmp.ne.s32.totalorder %s22_s16, %s552_s24  ;;  %p557_p12 = scmp.lt.s32.totalorder %s22_s16, %s22_s16 }
  0x1e   :  { %p558_p13 = scmp.lt.s32.totalorder %s556_s1, %s552_s24 }
  0x20   :  { %p559_p0 = por %p558_p13, %p557_p12 }
  0x22   :  { %p560_p1 = pnand %p559_p0, %p553_p11 }
  0x24   :  { %563 = shalt.err (!%p560_p1)
}
  0x25   :  { %s642_s25 = smov 32   ;;  %s643_s26 = smov 2  }
  0x26   :  { %27 = dma.hbm_to_vmem [thread:$0]  %s803_s0, 32, %s22_s16, [#allocation3], %s642_s25, %s642_s25, %s643_s26  }
  0x27   :  { %s644_s29 = smov [#allocation7]   ;;  %s645_s8 = smov [#allocation8]  }
  0x28   :  { %s47_s30 = sshll.u32 %s644_s29, 4  ;;  %s61_s9 = sshll.u32 %s645_s8, 4  ;;  %s48_s30 = int_to_ptr.vmem [resolvable:$true] %s47_s30  ;;  %s719_s9 = int_to_ptr.vmem [resolvable:$true] %s61_s9 }
  0x29   :  { %s564_s14 = scalar_lea.hbm %s806_s3, 1024 }
  0x2a   :  { %p565_p2 = scmp.ne.s32.totalorder %s806_s3, %s564_s14  ;;  %p568_p3 = scmp.lt.u32.totalorder %s564_s14, %s806_s3 }
  0x2c   :  { %p570_p4 = pnand %p568_p3, %p565_p2 }
  0x2e   :  { %573 = shalt.err (!%p570_p4)
}
  0x2f   :  { %s574_s0 = scalar_lea.vmem %s48_s30, 1024  ;;  %p579_p6 = scmp.lt.s32.totalorder %s48_s30, %s48_s30 }
  0x30   :  { %p575_p5 = scmp.ne.s32.totalorder %s48_s30, %s574_s0  ;;  %p580_p7 = scmp.lt.s32.totalorder %s574_s0, %s574_s0 }
  0x32   :  { %p581_p8 = por %p580_p7, %p579_p6 }
  0x34   :  { %p582_p9 = pnand %p581_p8, %p575_p5 }
  0x36   :  { %585 = shalt.err (!%p582_p9)
}
  0x37   :  { %53 = dma.hbm_to_vmem [thread:$0]  %s806_s3, 1024, %s48_s30, [#allocation6], %s639_s11, %s639_s11, %s640_s12  }
  0x38   :  { %s586_s23 = scalar_lea.hbm %s808_s5, 1024 }
  0x39   :  { %p587_p10 = scmp.ne.s32.totalorder %s808_s5, %s586_s23  ;;  %p590_p11 = scmp.lt.u32.totalorder %s586_s23, %s808_s5 }
  0x3b   :  { %p592_p12 = pnand %p590_p11, %p587_p10 }
  0x3d   :  { %595 = shalt.err (!%p592_p12)
}
  0x3e   :  { %s596_s29 = scalar_lea.vmem %s719_s9, 1024  ;;  %p601_p0 = scmp.lt.s32.totalorder %s719_s9, %s719_s9 }
  0x3f   :  { %p597_p13 = scmp.ne.s32.totalorder %s719_s9, %s596_s29  ;;  %p602_p1 = scmp.lt.s32.totalorder %s596_s29, %s596_s29 }
  0x41   :  { %p603_p2 = por %p602_p1, %p601_p0 }
  0x43   :  { %p604_p3 = pnand %p603_p2, %p597_p13 }
  0x45   :  { %607 = shalt.err (!%p604_p3)
}
  0x46   :  { %67 = dma.hbm_to_vmem [thread:$0]  %s808_s5, 1024, %s719_s9, [#allocation9], %s639_s11, %s639_s11, %s640_s12  }
  0x47   :  { %630 = dma.done.wait [#allocation3], 256  }
  0x48   :  { %631 = vsyncadd [#allocation3], 4294967040 }
  0x49   :  { %632 = dma.done.wait [#allocation6], 1152  }
  0x4a   :  { %633 = vsyncadd [#allocation6], 4294966144 }
  0x4b   :  { %634 = dma.done.wait [#allocation9], 1024  }
  0x4c   :  { %635 = vsyncadd [#allocation9], 4294966272  ;;  %v646_v0 = vmov 0.0   ;;  %vm647_vm0 = vmmov 0   ;;  %v499_v1 = vld [vmem:[#allocation5] sm:$0xff]   ;;  %v83_v2 = vld [vmem:[#allocation2] sm:$0xff] }
  0x4d   :  { %442 = vmatprep.subr.bf16.mxu0 %v646_v0  ;;  %444 = vmatprep.mubr.msk.bf16.mxu0 %vm647_vm0, %v646_v0  ;;  %v84_v3 = vld [vmem:[#allocation2 + $0x8] sm:$0xff]  ;;  %vm101_vm1 = vcmask 130048   ;;  %v500_v5 = vld [vmem:[#allocation7] sm:$0xff]   ;;  %v501_v6 = vld [vmem:[#allocation7 + $0x8] sm:$0xff]  }
  0x4e   :  { %448 = vmatprep.subr.bf16.mxu1 %v646_v0  ;;  %464 = vmatprep.mubr.msk.bf16.mxu1 %vm647_vm0, %v646_v0  ;;  %v85_v4 = vpack.c.bf16 %v84_v3, %v83_v2  ;;  %v502_v7 = vld [vmem:[#allocation7 + $0x10] sm:$0xff]   ;;  %v503_v8 = vld [vmem:[#allocation7 + $0x18] sm:$0xff]   ;;  %v504_v9 = vld [vmem:[#allocation7 + $0x20] sm:$0xff]  }
  0x4f   :  { %443 = vmatpush3.bf16.msra.mxu0 %v499_v1  ;;  %449 = vmatpush3.bf16.msra.mxu1 %v500_v5  ;;  %v505_v10 = vld [vmem:[#allocation7 + $0x28] sm:$0xff]   ;;  %v506_v11 = vld [vmem:[#allocation7 + $0x30] sm:$0xff]   ;;  %v507_v12 = vld [vmem:[#allocation7 + $0x38] sm:$0xff]  }
  0x50   :  { %468 = vmatprep.subr.bf16.mxu0 %v646_v0  ;;  %450 = vmatprep.subr.bf16.mxu1 %v646_v0  ;;  %v508_v13 = vld [vmem:[#allocation8] sm:$0xff]   ;;  %v509_v14 = vld [vmem:[#allocation8 + $0x8] sm:$0xff]   ;;  %v510_v15 = vld [vmem:[#allocation8 + $0x10] sm:$0xff]  }
  0x51   :  { %v511_v16 = vld [vmem:[#allocation8 + $0x18] sm:$0xff]   ;;  %v512_v17 = vld [vmem:[#allocation8 + $0x20] sm:$0xff]   ;;  %v513_v18 = vld [vmem:[#allocation8 + $0x28] sm:$0xff]  }
  0x52   :  { %445 = vmatmul.mubr.msk.bf16.vlgmr.msra.gmra.mrb[0].mxu0 %vm101_vm1, %v85_v4  ;;  %v401_v19 = vld [vmem:[%s805_s2] ss:$0 sm:$0xff]  ;;  %v514_v29 = vld [vmem:[#allocation8 + $0x30] sm:$0xff]   ;;  %v515_v30 = vld [vmem:[#allocation8 + $0x38] sm:$0xff]  }
  0x53   :  { %484 = vmatprep.mubr.msk.bf16.mxu0 %vm647_vm0, %v646_v0  ;;  %451 = vmatpush3.bf16.msra.mxu1 %v501_v6  ;;  %v404_v31 = vld [vmem:[%s807_s4] ss:$0 sm:$0xff] }
  0x54   :  { %452 = vmatprep.subr.bf16.mxu1 %v646_v0  ;;  %469 = vmatpush3.bf16.msra.mxu0 %v508_v13  ;;  %v413_v41 = vld [vmem:[%s809_s6] ss:$0 sm:$0xff] }
  0x55   :  { %470 = vmatprep.subr.bf16.mxu0 %v646_v0 }
  0x57   :  { %453 = vmatpush3.bf16.msra.mxu1 %v502_v7 }
  0x58   :  { %454 = vmatprep.subr.bf16.mxu1 %v646_v0  ;;  %471 = vmatpush3.bf16.msra.mxu0 %v509_v14 }
  0x59   :  { %472 = vmatprep.subr.bf16.mxu0 %v646_v0 }
  0x5b   :  { %455 = vmatpush3.bf16.msra.mxu1 %v503_v8 }
  0x5c   :  { %456 = vmatprep.subr.bf16.mxu1 %v646_v0  ;;  %473 = vmatpush3.bf16.msra.mxu0 %v510_v15 }
  0x5d   :  { %474 = vmatprep.subr.bf16.mxu0 %v646_v0 }
  0x5f   :  { %457 = vmatpush3.bf16.msra.mxu1 %v504_v9 }
  0x60   :  { %458 = vmatprep.subr.bf16.mxu1 %v646_v0  ;;  %475 = vmatpush3.bf16.msra.mxu0 %v511_v16 }
  0x61   :  { %476 = vmatprep.subr.bf16.mxu0 %v646_v0 }
  0x63   :  { %459 = vmatpush3.bf16.msra.mxu1 %v505_v10 }
  0x64   :  { %460 = vmatprep.subr.bf16.mxu1 %v646_v0  ;;  %477 = vmatpush3.bf16.msra.mxu0 %v512_v17 }
  0x65   :  { %478 = vmatprep.subr.bf16.mxu0 %v646_v0 }
  0x67   :  { %461 = vmatpush3.bf16.msra.mxu1 %v506_v11 }
  0x68   :  { %462 = vmatprep.subr.bf16.mxu1 %v646_v0  ;;  %479 = vmatpush3.bf16.msra.mxu0 %v513_v18 }
  0x69   :  { %480 = vmatprep.subr.bf16.mxu0 %v646_v0 }
  0x6b   :  { %463 = vmatpush3.bf16.msra.mxu1 %v507_v12 }
  0x6c   :  { %481 = vmatpush3.bf16.msra.mxu0 %v514_v29 }
  0x6d   :  { %482 = vmatprep.subr.bf16.mxu0 %v646_v0 }
  0x70   :  { %483 = vmatpush3.bf16.msra.mxu0 %v515_v30 }
 0x125   :  { %v139_v20 = vpop.f32.mrb[0].mxu0 }
 0x126   :  { %v140_v21 = vadd.f32 %v401_v19, %v139_v20  ;;  %v446_v22 = vpop.f32.mrb[1].mxu0 }
 0x127   :  { %v142_v23 = vpop.f32.mrb[2].mxu0 }
 0x128   :  { %v143_v24 = vadd.f32 %v401_v19, %v142_v23  ;;  %v447_v25 = vpop.f32.mrb[3].mxu0  ;;  %v146_v26 = vmax.f32 %v140_v21, 0.0 }
 0x12a   :  { %v147_v27 = vmax.f32 %v143_v24, 0.0 }
 0x12c   :  { %v148_v28 = vpack.c.bf16 %v147_v27, %v146_v26 }
 0x12e   :  { %465 = vmatmul.mubr.bf16.vlgmr.msra.gmra.mrb[0].mxu1 %v148_v28 }
 0x201   :  { %v254_v32 = vpop.f32.mrb[0].mxu1 }
 0x202   :  { %v255_v33 = vadd.f32 %v404_v31, %v254_v32  ;;  %v466_v34 = vpop.f32.mrb[1].mxu1 }
 0x203   :  { %v257_v35 = vpop.f32.mrb[2].mxu1 }
 0x204   :  { %v258_v36 = vadd.f32 %v404_v31, %v257_v35  ;;  %v467_v37 = vpop.f32.mrb[3].mxu1  ;;  %v261_v38 = vmax.f32 %v255_v33, 0.0 }
 0x206   :  { %v262_v39 = vmax.f32 %v258_v36, 0.0 }
 0x208   :  { %v263_v40 = vpack.c.bf16 %v262_v39, %v261_v38 }
 0x20a   :  { %485 = vmatmul.mubr.bf16.vlgmr.msra.gmra.mrb[4].mxu0 %v263_v40 }
 0x2dd   :  { %v369_v42 = vpop.f32.mrb[4].mxu0 }
 0x2de   :  { %v370_v43 = vadd.f32 %v413_v41, %v369_v42  ;;  %v486_v44 = vpop.f32.mrb[5].mxu0 }
 0x2df   :  { %v372_v45 = vpop.f32.mrb[6].mxu0 }
 0x2e0   :  { %516 = vtanh.f32 %v370_v43  ;;  %v373_v46 = vadd.f32 %v413_v41, %v372_v45  ;;  %v487_v47 = vpop.f32.mrb[7].mxu0 }
 0x2e2   :  { %518 = vtanh.f32 %v373_v46 }
 0x2ea   :  { %v517_v48 = vpop.eup %516 }
 0x2eb   :  { %v378_v49 = vmul.f32 2.0, %v517_v48 }
 0x2ec   :  { %v519_v50 = vpop.eup %518 }
 0x2ed   :  { %380 = vst [vmem:[#allocation10] sm:$0xff] %v378_v49  ;;  %v379_v51 = vmul.f32 2.0, %v519_v50 }
 0x2ef   :  { %381 = vst [vmem:[#allocation10 + $0x8] sm:$0xff] %v379_v51 }
 0x2f0   :  { %386 = vsyncadd [#allocation4], 224  ;;  %s648_s4 = smov [#allocation10]  }
 0x2f1   :  { %s387_s10 = sshll.u32 %s648_s4, 4  ;;  %s388_s10 = int_to_ptr.vmem [resolvable:$true] %s387_s10 }
 0x2f2   :  { %s608_s13 = scalar_lea.vmem %s388_s10, 32  ;;  %s612_s6 = scalar_lea.vmem %s388_s10, 256 }
 0x2f3   :  { %p609_p4 = scmp.ne.s32.totalorder %s388_s10, %s608_s13  ;;  %p613_p5 = scmp.lt.s32.totalorder %s388_s10, %s388_s10 }
 0x2f4   :  { %p614_p6 = scmp.lt.s32.totalorder %s612_s6, %s608_s13 }
 0x2f6   :  { %p615_p7 = por %p614_p6, %p613_p5 }
 0x2f8   :  { %p616_p8 = pnand %p615_p7, %p609_p4 }
 0x2fa   :  { %619 = shalt.err (!%p616_p8)
}
 0x2fb   :  { %s620_s17 = scalar_lea.hbm %s810_s7, 32 }
 0x2fc   :  { %p621_p9 = scmp.ne.s32.totalorder %s810_s7, %s620_s17  ;;  %p624_p10 = scmp.lt.u32.totalorder %s620_s17, %s810_s7 }
 0x2fe   :  { %p626_p11 = pnand %p624_p10, %p621_p9 }
 0x300   :  { %629 = shalt.err (!%p626_p11)
}
 0x301   :  { %393 = dma.vmem_to_hbm [thread:$0]  %s388_s10, 32, %s810_s7, [#allocation4], %s642_s25, %s642_s25, %s643_s26  }
 0x302   :  { %636 = dma.done.wait [#allocation4], 256  }
 0x303   :  { %637 = vsyncadd [#allocation4], 4294967040 }
 0x304   :  { %397 = vsyncpa [#allocation3], 1 }
 0x305   :  { %398 = vsyncpa [#allocation6], 1 }
 0x306   :  { %399 = vsyncpa [#allocation9], 1 }
 0x307   :  { %400 = vsyncpa [#allocation4], 1 }

</bundles_post_ra>
